<compile_context>
chip_gen: v7x
topology: tpu7x:2x2x1
jax: 0.10.0
libtpu: 0.0.40
codegen_flags: <defaults>
</compile_context>

<pallas_src>
import functools

import jax
import jax.numpy as jnp
from jax.experimental import pallas as pl
from jax.experimental.pallas import tpu as pltpu


# ---------------------------------------------------------------------------
# helpers
# ---------------------------------------------------------------------------

def _round_up(x, m):
    return ((x + m - 1) // m) * m


def _pick_tile(dim, pref):
    """Largest tile <= pref that divides `dim` (dim is a multiple of 128)."""
    t = min(pref, dim)
    while dim % t:
        t -= 128
    return t


def _pad2d(x, rows, cols):
    return jnp.pad(x, ((0, rows - x.shape[0]), (0, cols - x.shape[1])))


# ---------------------------------------------------------------------------
# Pallas kernels
# ---------------------------------------------------------------------------

def _mm_kernel(a_ref, b_ref, o_ref, acc_ref):
    """o = a @ b, tiled over (i, j, k) with an f32 accumulator."""
    @pl.when(pl.program_id(2) == 0)
    def _():
        acc_ref[...] = jnp.zeros_like(acc_ref)

    acc_ref[...] += jnp.dot(a_ref[...], b_ref[...],
                            preferred_element_type=jnp.float32)

    @pl.when(pl.program_id(2) == pl.num_programs(2) - 1)
    def _():
        o_ref[...] = acc_ref[...].astype(o_ref.dtype)


def _mm_bias_kernel(a_ref, b_ref, bias_ref, o_ref, acc_ref, *, relu):
    """o = relu?(a @ b + bias); bias/ReLU applied once in the k==last epilogue (f32)."""
    @pl.when(pl.program_id(2) == 0)
    def _():
        acc_ref[...] = jnp.zeros_like(acc_ref)

    acc_ref[...] += jnp.dot(a_ref[...], b_ref[...],
                            preferred_element_type=jnp.float32)

    @pl.when(pl.program_id(2) == pl.num_programs(2) - 1)
    def _():
        h = acc_ref[...] + bias_ref[...]          # f32 epilogue (v5e-safe)
        if relu:
            h = jnp.maximum(h, 0.0)
        o_ref[...] = h.astype(o_ref.dtype)


def _tiled_matmul(a, b, bias=None, *, relu=False, out_dtype=jnp.float32,
                  tm_pref=256, tn_pref=256, tk_pref=512):
    """Tiled matmul pallas_call: out = [relu](a @ b [+ bias]). Dims are 128-multiples."""
    m, k = a.shape
    k2, n = b.shape
    assert k == k2, (a.shape, b.shape)
    tm = _pick_tile(m, tm_pref)
    tn = _pick_tile(n, tn_pref)
    tk = _pick_tile(k, tk_pref)
    grid = (m // tm, n // tn, k // tk)

    in_specs = [
        pl.BlockSpec((tm, tk), lambda i, j, kk: (i, kk)),
        pl.BlockSpec((tk, tn), lambda i, j, kk: (kk, j)),
    ]
    operands = [a, b]
    if bias is not None:
        in_specs.append(pl.BlockSpec((1, tn), lambda i, j, kk: (0, j)))
        operands.append(bias)
        kernel = functools.partial(_mm_bias_kernel, relu=relu)
    else:
        kernel = _mm_kernel

    flops = 2 * m * n * k
    bytes_accessed = (m * k * a.dtype.itemsize
                      + k * n * b.dtype.itemsize
                      + m * n * jnp.dtype(out_dtype).itemsize)

    return pl.pallas_call(
        kernel,
        out_shape=jax.ShapeDtypeStruct((m, n), out_dtype),
        grid=grid,
        in_specs=in_specs,
        out_specs=pl.BlockSpec((tm, tn), lambda i, j, kk: (i, j)),
        scratch_shapes=[pltpu.VMEM((tm, tn), jnp.float32)],
        compiler_params=pltpu.CompilerParams(
            dimension_semantics=("parallel", "parallel", "arbitrary"),
            vmem_limit_bytes=48 * 1024 * 1024,
        ),
        cost_estimate=pl.CostEstimate(
            flops=flops, transcendentals=0, bytes_accessed=bytes_accessed),
    )(*operands)


# ---------------------------------------------------------------------------
# GCN model glue
# ---------------------------------------------------------------------------

def build_normalized_adjacency(edge_index, num_nodes, n_pad):
    """Dense D^{-1/2}(A+I)D^{-1/2} from [2, E] edge_index, padded to n_pad, bf16.

    Duplicate edges are counted (scatter-add, like PyG's degree computation) and
    self-loops are only added for nodes that lack one (add_remaining_self_loops)."""
    src, dst = edge_index[0], edge_index[1]
    a = jnp.zeros((num_nodes, num_nodes), jnp.float32).at[dst, src].add(1.0)
    diag = jnp.diagonal(a)
    a = a + jnp.diag(jnp.where(diag > 0.0, 0.0, 1.0))
    deg = jnp.sum(a, axis=1)
    d_inv_sqrt = jnp.where(deg > 0.0, jax.lax.rsqrt(deg), 0.0)
    a_norm = d_inv_sqrt[:, None] * a * d_inv_sqrt[None, :]
    a_norm = _pad2d(a_norm, n_pad, n_pad)        # zero rows/cols for padded nodes
    return a_norm.astype(jnp.bfloat16)


def init_gcn_params(key, in_channels, hidden_channels, num_layers, out_channels):
    """Glorot-style init matching the GCN(in, hidden, L, out) stack."""
    dims = [in_channels] + [hidden_channels] * (num_layers - 1) + [out_channels]
    params = []
    for l in range(num_layers):
        key, wk = jax.random.split(key)
        fan_in, fan_out = dims[l], dims[l + 1]
        scale = jnp.sqrt(6.0 / (fan_in + fan_out))
        w = jax.random.uniform(wk, (fan_in, fan_out), jnp.float32, -scale, scale)
        b = jnp.zeros((1, fan_out), dtype=jnp.float32)
        params.append((w, b))
    return params


def gnn_wrapper_forward(x, edge_index, params, batch=None):
    """Forward pass of GNNWrapper (non-MLP branch): GCN(x, edge_index).

    `batch` is accepted for API parity but unused (basic GCN does no pooling)."""
    num_nodes, in_channels = x.shape
    out_channels = params[-1][0].shape[1]

    n_pad = _round_up(num_nodes, 128)
    a_norm = build_normalized_adjacency(edge_index, num_nodes, n_pad)

    # Pad node features to lane-dense shape; activations live in bf16 between layers.
    f_in_pad = _round_up(in_channels, 128)
    h = _pad2d(x.astype(jnp.float32), n_pad, f_in_pad).astype(jnp.bfloat16)

    num_layers = len(params)
    for l, (w, b) in enumerate(params):
        f_in, f_out = w.shape
        f_out_pad = _round_up(f_out, 128)
        w_pad = _pad2d(w, _round_up(f_in, 128), f_out_pad).astype(jnp.bfloat16)
        b_pad = _pad2d(b, 1, f_out_pad)                      # f32 bias
        last = (l == num_layers - 1)

        # (1) dense transform: XW = H @ W_l   (done once, not inside the A-reduction)
        xw = _tiled_matmul(h, w_pad, out_dtype=jnp.bfloat16,
                           tm_pref=256, tn_pref=256, tk_pref=512)

        # (2) aggregation: H = relu?(A_norm @ XW + b_l)
        h = _tiled_matmul(a_norm, xw, bias=b_pad, relu=not last,
                          out_dtype=jnp.float32 if last else jnp.bfloat16,
                          tm_pref=256, tn_pref=256, tk_pref=1024)

    return h[:num_nodes, :out_channels]


# ---------------------------------------------------------------------------
# demo / smoke test
# ---------------------------------------------------------------------------

if __name__ == "__main__":
    key = jax.random.PRNGKey(0)

    num_nodes = 16
    in_channels = 4
    hidden_channels = 32
    num_layers = 3
    out_channels = 1

    key, xk = jax.random.split(key)
    x = jax.random.normal(xk, (num_nodes, in_channels), dtype=jnp.float32)

    # Deterministic edge_index [2, E]: a ring plus a few extra directed edges.
    ring_src = jnp.arange(num_nodes, dtype=jnp.int32)
    ring_dst = (ring_src + 1) % num_nodes
    extra_src = jnp.array([0, 3, 7, 12], dtype=jnp.int32)
    extra_dst = jnp.array([8, 11, 2, 5], dtype=jnp.int32)
    edge_index = jnp.stack(
        [jnp.concatenate([ring_src, extra_src]),
         jnp.concatenate([ring_dst, extra_dst])],
        axis=0,
    )

    params = init_gcn_params(key, in_channels, hidden_channels, num_layers,
                             out_channels)

    out = gnn_wrapper_forward(x, edge_index, params, batch=None)
    jax.block_until_ready(out)

    assert out.shape == (num_nodes, out_channels), out.shape
    assert bool(jnp.all(jnp.isfinite(out)))
    print("KERNEL_OK")
</pallas_src>

<mosaic_0001>
module attributes {stable_mosaic.version = 11 : i64} {
  func.func @_mm_kernel(%arg0: i32, %arg1: i32, %arg2: i32, %arg3: memref<128x128xbf16, #tpu.memory_space<vmem>>, %arg4: memref<128x128xbf16, #tpu.memory_space<vmem>>, %arg5: memref<128x128xbf16, #tpu.memory_space<vmem>>, %arg6: memref<128x128xf32, #tpu.memory_space<vmem>>) attributes {dimension_semantics = [#tpu.dimension_semantics<parallel>, #tpu.dimension_semantics<parallel>, #tpu.dimension_semantics<arbitrary>], iteration_bounds = array<i64: 1, 1, 1>, scalar_prefetch = 0 : i64, scratch_operands = 1 : i64, tpu.core_type = #tpu.core_type<tc>, window_params = [{transform_indices = @transform_0, window_bounds = array<i64: 128, 128>}, {transform_indices = @transform_1, window_bounds = array<i64: 128, 128>}, {transform_indices = @transform_2, window_bounds = array<i64: 128, 128>}]} {
    %c0_i32 = arith.constant 0 : i32
    %0 = arith.cmpi eq, %arg2, %c0_i32 : i32
    %1 = arith.extui %0 : i1 to i32
    %c0_i32_0 = arith.constant 0 : i32
    %2 = arith.cmpi ne, %1, %c0_i32_0 : i32
    scf.if %2 {
      %cst_10 = arith.constant 0.000000e+00 : f32
      %12 = vector.broadcast %cst_10 : f32 to vector<128x128xf32>
      %c0_11 = arith.constant 0 : index
      %c0_12 = arith.constant 0 : index
      %13 = vector.load %arg6[%c0_11, %c0_12] : memref<128x128xf32, #tpu.memory_space<vmem>>, vector<128x128xf32>
      tpu.vector_store %arg6[%c0_11, %c0_12], %12 {strides = array<i32>} : memref<128x128xf32, #tpu.memory_space<vmem>>, vector<128x128xf32>,
    } else {
    }
    %c0 = arith.constant 0 : index
    %c0_1 = arith.constant 0 : index
    %3 = vector.load %arg6[%c0, %c0_1] : memref<128x128xf32, #tpu.memory_space<vmem>>, vector<128x128xf32>
    %c0_2 = arith.constant 0 : index
    %c0_3 = arith.constant 0 : index
    %4 = vector.load %arg3[%c0_2, %c0_3] : memref<128x128xbf16, #tpu.memory_space<vmem>>, vector<128x128xbf16>
    %c0_4 = arith.constant 0 : index
    %c0_5 = arith.constant 0 : index
    %5 = vector.load %arg4[%c0_4, %c0_5] : memref<128x128xbf16, #tpu.memory_space<vmem>>, vector<128x128xbf16>
    %cst = arith.constant dense<0.000000e+00> : vector<128x128xf32>
    %6 = tpu.matmul %4, %5, %cst {dimension_numbers = #tpu.dot_dimension_numbers<[1], [0], [0], [1], [0, 0, 1, 1], [], []>} : vector<128x128xbf16>, vector<128x128xbf16>, vector<128x128xf32> -> vector<128x128xf32>
    %7 = arith.addf %3, %6 : vector<128x128xf32>
    %c0_6 = arith.constant 0 : index
    %c0_7 = arith.constant 0 : index
    %8 = vector.load %arg6[%c0_6, %c0_7] : memref<128x128xf32, #tpu.memory_space<vmem>>, vector<128x128xf32>
    tpu.vector_store %arg6[%c0_6, %c0_7], %7 {strides = array<i32>} : memref<128x128xf32, #tpu.memory_space<vmem>>, vector<128x128xf32>,
    %c0_i32_8 = arith.constant 0 : i32
    %9 = arith.cmpi eq, %arg2, %c0_i32_8 : i32
    %10 = arith.extui %9 : i1 to i32
    %c0_i32_9 = arith.constant 0 : i32
    %11 = arith.cmpi ne, %10, %c0_i32_9 : i32
    scf.if %11 {
      %c0_10 = arith.constant 0 : index
      %c0_11 = arith.constant 0 : index
      %12 = vector.load %arg6[%c0_10, %c0_11] : memref<128x128xf32, #tpu.memory_space<vmem>>, vector<128x128xf32>
      %13 = arith.truncf %12 : vector<128x128xf32> to vector<128x128xbf16>
      %c0_12 = arith.constant 0 : index
      %c0_13 = arith.constant 0 : index
      %14 = vector.load %arg5[%c0_12, %c0_13] : memref<128x128xbf16, #tpu.memory_space<vmem>>, vector<128x128xbf16>
      tpu.vector_store %arg5[%c0_12, %c0_13], %13 {strides = array<i32>} : memref<128x128xbf16, #tpu.memory_space<vmem>>, vector<128x128xbf16>,
    } else {
    }
    return
  }
  func.func @transform_0(%arg0: i32, %arg1: i32, %arg2: i32) -> (i32, i32) {
    %c0_i32 = arith.constant 0 : i32
    return %arg0, %arg2 : i32, i32
  }
  func.func @transform_1(%arg0: i32, %arg1: i32, %arg2: i32) -> (i32, i32) {
    %c0_i32 = arith.constant 0 : i32
    return %arg2, %arg1 : i32, i32
  }
  func.func @transform_2(%arg0: i32, %arg1: i32, %arg2: i32) -> (i32, i32) {
    %c0_i32 = arith.constant 0 : i32
    return %arg0, %arg1 : i32, i32
  }
}

</mosaic_0001>

<bundles_post_ra>
// kernel: tpu_custom_call.1
= control target key start
LH: loop header
LB: loop body
LE: loop exit
PB: predicated region body
PF: predicated region fallthrough
CT: control target
= control target key end

     0   :  { %7 = vsyncpa [#allocation4], 0  ;;  %s768_s0 = inlined_call_operand.hbm [shape: bf16[128,128], index: 0, kind: input, shape index: {}]   ;;  %s769_s1 = inlined_call_operand.hbm [shape: bf16[128,128], index: 1, kind: input, shape index: {}]   ;;  %s770_s2 = inlined_call_operand.hbm [shape: bf16[128,128], index: 2, kind: output, shape index: {}]  }
   0x1   :  { %8 = vsyncpa [#allocation7], 0 }
   0x2   :  { %9 = vsyncpa [#allocation5], 0  ;;  %s703_s9 = smov [#allocation3]   ;;  %s631_s13 = scalar_lea.hbm %s768_s0, 1024 }
   0x3   :  { %s15_s10 = sshll.u32 %s703_s9, 4  ;;  %p632_p0 = scmp.ne.s32.totalorder %s768_s0, %s631_s13  ;;  %s16_s10 = int_to_ptr.vmem [resolvable:$true] %s15_s10 }
   0x4   :  { %p635_p1 = scmp.lt.u32.totalorder %s631_s13, %s768_s0 }
   0x6   :  { %p637_p2 = pnand %p635_p1, %p632_p0 }
   0x8   :  { %640 = shalt.err (!%p637_p2)
}
   0x9   :  { %s641_s18 = scalar_lea.vmem %s16_s10, 1024  ;;  %p646_p4 = scmp.lt.s32.totalorder %s16_s10, %s16_s10 }
   0xa   :  { %p642_p3 = scmp.ne.s32.totalorder %s16_s10, %s641_s18  ;;  %p647_p5 = scmp.lt.s32.totalorder %s641_s18, %s641_s18 }
   0xc   :  { %p648_p6 = por %p647_p5, %p646_p4 }
   0xe   :  { %p649_p7 = pnand %p648_p6, %p642_p3 }
  0x10   :  { %652 = shalt.err (!%p649_p7)
}
  0x11   :  { %s704_s19 = smov 64   ;;  %s705_s20 = smov 4  }
  0x12   :  { %21 = dma.hbm_to_vmem [thread:$0]  %s768_s0, 1024, %s16_s10, [#allocation4], %s704_s19, %s704_s19, %s705_s20  }
  0x13   :  { %s706_s23 = smov [#allocation6]   ;;  %s653_s27 = scalar_lea.hbm %s769_s1, 1024 }
  0x14   :  { %s27_s24 = sshll.u32 %s706_s23, 4  ;;  %p654_p8 = scmp.ne.s32.totalorder %s769_s1, %s653_s27  ;;  %s28_s24 = int_to_ptr.vmem [resolvable:$true] %s27_s24 }
  0x15   :  { %p657_p9 = scmp.lt.u32.totalorder %s653_s27, %s769_s1 }
  0x17   :  { %p659_p10 = pnand %p657_p9, %p654_p8 }
  0x19   :  { %662 = shalt.err (!%p659_p10)
}
  0x1a   :  { %s663_s4 = scalar_lea.vmem %s28_s24, 1024  ;;  %p668_p12 = scmp.lt.s32.totalorder %s28_s24, %s28_s24 }
  0x1b   :  { %p664_p11 = scmp.ne.s32.totalorder %s28_s24, %s663_s4  ;;  %p669_p13 = scmp.lt.s32.totalorder %s663_s4, %s663_s4 }
  0x1d   :  { %p670_p0 = por %p669_p13, %p668_p12 }
  0x1f   :  { %p671_p1 = pnand %p670_p0, %p664_p11 }
  0x21   :  { %674 = shalt.err (!%p671_p1)
}
  0x22   :  { %33 = dma.hbm_to_vmem [thread:$0]  %s769_s1, 1024, %s28_s24, [#allocation7], %s704_s19, %s704_s19, %s705_s20  }
  0x23   :  { %697 = dma.done.wait [#allocation4], 1024  }
  0x24   :  { %698 = vsyncadd [#allocation4], 4294966272 }
  0x25   :  { %699 = dma.done.wait [#allocation7], 1024  }
  0x26   :  { %700 = vsyncadd [#allocation7], 4294966272  ;;  %v615_v0 = vld [vmem:[#allocation6] sm:$0xff]   ;;  %v616_v1 = vld [vmem:[#allocation6 + $0x8] sm:$0xff]   ;;  %s707_s1 = smov [#allocation8]  }
  0x27   :  { %562 = vmatprep.subr.bf16.mxu0 %v615_v0  ;;  %594 = vmatprep.subr.bf16.mxu1 %v615_v0  ;;  %v617_v2 = vld [vmem:[#allocation6 + $0x10] sm:$0xff]   ;;  %v618_v3 = vld [vmem:[#allocation6 + $0x18] sm:$0xff]   ;;  %v623_v4 = vld [vmem:[#allocation3] sm:$0xff]   ;;  %s438_s6 = sshll.u32 %s707_s1, 4  ;;  %s439_s6 = int_to_ptr.vmem [resolvable:$true] %s438_s6 }
  0x28   :  { %563 = vmatpush3.bf16.msra.mxu0 %v615_v0  ;;  %602 = vmatpush3.bf16.msra.mxu1 %v615_v0  ;;  %v624_v5 = vld [vmem:[#allocation3 + $0x20] sm:$0xff]   ;;  %v620_v7 = vld [vmem:[#allocation6 + $0x28] sm:$0xff]   ;;  %v621_v8 = vld [vmem:[#allocation6 + $0x30] sm:$0xff]   ;;  %s675_s7 = scalar_lea.vmem %s439_s6, 1024  ;;  %p680_p3 = scmp.lt.s32.totalorder %s439_s6, %s439_s6 }
  0x29   :  { %564 = vmatprep.subr.bf16.mxu0 %v616_v1  ;;  %595 = vmatprep.subr.bf16.mxu1 %v616_v1  ;;  %v619_v6 = vld [vmem:[#allocation6 + $0x20] sm:$0xff]   ;;  %v622_v9 = vld [vmem:[#allocation6 + $0x38] sm:$0xff]   ;;  %v625_v10 = vld [vmem:[#allocation3 + $0x8] sm:$0xff]   ;;  %p676_p2 = scmp.ne.s32.totalorder %s439_s6, %s675_s7  ;;  %p681_p4 = scmp.lt.s32.totalorder %s675_s7, %s675_s7 }
  0x2a   :  { %578 = vmatprep.mubr.bf16.mxu0 %v623_v4  ;;  %586 = vmatprep.mubr.bf16.mxu1 %v624_v5  ;;  %v626_v11 = vld [vmem:[#allocation3 + $0x28] sm:$0xff]   ;;  %v627_v12 = vld [vmem:[#allocation3 + $0x10] sm:$0xff]   ;;  %v629_v14 = vld [vmem:[#allocation3 + $0x18] sm:$0xff]  }
  0x2b   :  { %v628_v13 = vld [vmem:[#allocation3 + $0x30] sm:$0xff]   ;;  %v630_v15 = vld [vmem:[#allocation3 + $0x38] sm:$0xff]   ;;  %p682_p5 = por %p681_p4, %p680_p3 }
  0x2c   :  { %565 = vmatpush3.bf16.msra.mxu0 %v616_v1  ;;  %603 = vmatpush3.bf16.msra.mxu1 %v616_v1 }
  0x2d   :  { %566 = vmatprep.subr.bf16.mxu0 %v617_v2  ;;  %596 = vmatprep.subr.bf16.mxu1 %v617_v2  ;;  %p683_p6 = pnand %p682_p5, %p676_p2 }
  0x30   :  { %567 = vmatpush3.bf16.msra.mxu0 %v617_v2  ;;  %604 = vmatpush3.bf16.msra.mxu1 %v617_v2 }
  0x31   :  { %568 = vmatprep.subr.bf16.mxu0 %v618_v3  ;;  %597 = vmatprep.subr.bf16.mxu1 %v618_v3 }
  0x34   :  { %569 = vmatpush3.bf16.msra.mxu0 %v618_v3  ;;  %605 = vmatpush3.bf16.msra.mxu1 %v618_v3 }
  0x35   :  { %570 = vmatprep.subr.bf16.mxu0 %v619_v6  ;;  %598 = vmatprep.subr.bf16.mxu1 %v619_v6 }
  0x38   :  { %571 = vmatpush3.bf16.msra.mxu0 %v619_v6  ;;  %606 = vmatpush3.bf16.msra.mxu1 %v619_v6 }
  0x39   :  { %572 = vmatprep.subr.bf16.mxu0 %v620_v7  ;;  %599 = vmatprep.subr.bf16.mxu1 %v620_v7 }
  0x3c   :  { %573 = vmatpush3.bf16.msra.mxu0 %v620_v7  ;;  %607 = vmatpush3.bf16.msra.mxu1 %v620_v7 }
  0x3d   :  { %574 = vmatprep.subr.bf16.mxu0 %v621_v8  ;;  %600 = vmatprep.subr.bf16.mxu1 %v621_v8 }
  0x40   :  { %575 = vmatpush3.bf16.msra.mxu0 %v621_v8  ;;  %608 = vmatpush3.bf16.msra.mxu1 %v621_v8 }
  0x41   :  { %576 = vmatprep.subr.bf16.mxu0 %v622_v9  ;;  %601 = vmatprep.subr.bf16.mxu1 %v622_v9 }
  0x44   :  { %577 = vmatpush3.bf16.msra.mxu0 %v622_v9  ;;  %609 = vmatpush3.bf16.msra.mxu1 %v622_v9 }
  0x47   :  { %579 = vmatmul.mubr.bf16.vlgmr.msra.gmra.mrb[0].mxu0 %v625_v10  ;;  %587 = vmatmul.mubr.bf16.vlgmr.msra.gmra.mrb[0].mxu1 %v626_v11 }
  0x48   :  { %582 = vmatprep.mubr.bf16.mxu0 %v627_v12  ;;  %590 = vmatprep.mubr.bf16.mxu1 %v628_v13 }
  0x4f   :  { %583 = vmatmul.mubr.bf16.gmra.mrb[4].mxu0 %v629_v14  ;;  %591 = vmatmul.mubr.bf16.gmra.mrb[4].mxu1 %v630_v15 }
 0x11a   :  { %v580_v16 = vpop.f32.mrb[0].mxu0  ;;  %v588_v17 = vpop.f32.mrb[0].mxu1 }
 0x11b   :  { %v239_v18 = vpop.f32.mrb[1].mxu0  ;;  %v271_v19 = vpop.f32.mrb[1].mxu1 }
 0x11c   :  { %v581_v20 = vpop.f32.mrb[2].mxu0  ;;  %v589_v21 = vpop.f32.mrb[2].mxu1 }
 0x11d   :  { %v507_v22 = vpack.c.bf16 %v581_v20, %v580_v16  ;;  %v527_v23 = vpack.c.bf16 %v589_v21, %v588_v17  ;;  %v242_v24 = vpop.f32.mrb[3].mxu0  ;;  %v274_v25 = vpop.f32.mrb[3].mxu1 }
 0x11e   :  { %v502_v26 = vpack.c.bf16 %v242_v24, %v239_v18  ;;  %v522_v27 = vpack.c.bf16 %v274_v25, %v271_v19 }
 0x11f   :  { %539 = vst [vmem:[#allocation8 + $0x8] sm:$0xff] %v507_v22   ;;  %543 = vst [vmem:[#allocation8 + $0x28] sm:$0xff] %v527_v23  }
 0x120   :  { %503 = vst [vmem:[#allocation8] sm:$0xff] %v502_v26   ;;  %542 = vst [vmem:[#allocation8 + $0x20] sm:$0xff] %v522_v27  }
 0x122   :  { %v584_v28 = vpop.f32.mrb[4].mxu0  ;;  %v592_v29 = vpop.f32.mrb[4].mxu1 }
 0x123   :  { %v255_v30 = vpop.f32.mrb[5].mxu0  ;;  %v287_v31 = vpop.f32.mrb[5].mxu1 }
 0x124   :  { %v585_v32 = vpop.f32.mrb[6].mxu0  ;;  %v593_v33 = vpop.f32.mrb[6].mxu1 }
 0x125   :  { %v517_v34 = vpack.c.bf16 %v585_v32, %v584_v28  ;;  %v537_v35 = vpack.c.bf16 %v593_v33, %v592_v29  ;;  %v258_v36 = vpop.f32.mrb[7].mxu0  ;;  %v290_v37 = vpop.f32.mrb[7].mxu1 }
 0x126   :  { %v512_v38 = vpack.c.bf16 %v258_v36, %v255_v30  ;;  %v532_v39 = vpack.c.bf16 %v290_v37, %v287_v31 }
 0x127   :  { %541 = vst [vmem:[#allocation8 + $0x18] sm:$0xff] %v517_v34   ;;  %545 = vst [vmem:[#allocation8 + $0x38] sm:$0xff] %v537_v35  }
 0x128   :  { %540 = vst [vmem:[#allocation8 + $0x10] sm:$0xff] %v512_v38   ;;  %544 = vst [vmem:[#allocation8 + $0x30] sm:$0xff] %v532_v39  }
 0x129   :  { %686 = shalt.err (!%p683_p6)
}
 0x12a   :  { %s687_s10 = scalar_lea.hbm %s770_s2, 1024 }
 0x12b   :  { %p688_p7 = scmp.ne.s32.totalorder %s770_s2, %s687_s10  ;;  %p691_p8 = scmp.lt.u32.totalorder %s687_s10, %s770_s2 }
 0x12d   :  { %p693_p9 = pnand %p691_p8, %p688_p7 }
 0x12f   :  { %696 = shalt.err (!%p693_p9)
}
 0x130   :  { %444 = dma.vmem_to_hbm [thread:$0]  %s439_s6, 1024, %s770_s2, [#allocation5], %s704_s19, %s704_s19, %s705_s20  }
 0x131   :  { %701 = dma.done.wait [#allocation5], 1024  }
 0x132   :  { %702 = vsyncadd [#allocation5], 4294966272 }
 0x133   :  { %448 = vsyncpa [#allocation4], 1 }
 0x134   :  { %449 = vsyncpa [#allocation7], 1 }
 0x135   :  { %450 = vsyncpa [#allocation5], 1 }

</bundles_post_ra>
